<compile_context>
chip_gen: v6e
topology: v6e:2x2x1
jax: 0.10.0
libtpu: 0.0.40
codegen_flags: <defaults>
</compile_context>

<pallas_src>
import functools
import math

import numpy as np
import jax
import jax.numpy as jnp
from jax import lax
from jax.experimental import pallas as pl
from jax.experimental.pallas import tpu as pltpu

_BLK = 128  # lane width == diagonal block edge


# ----------------------------------------------------------------------------
# Kernel 1a: score = tanh(diag(M)) for small N (single full block).
# ----------------------------------------------------------------------------
def _diag_tanh_small_kernel(m_ref, s_ref):
    m = m_ref[...].astype(jnp.float32)
    n = m.shape[0]
    rows = lax.broadcasted_iota(jnp.int32, (n, n), 0)
    cols = lax.broadcasted_iota(jnp.int32, (n, n), 1)
    diag = jnp.sum(jnp.where(rows == cols, m, jnp.zeros_like(m)),
                   axis=0, keepdims=True)
    s_ref[...] = jnp.tanh(diag)                           # EUP tanh


# ----------------------------------------------------------------------------
# Kernel 1b: score = tanh(diag(M)) for large N.
#   M stays in HBM; each grid step owns a contiguous run of (128,128) diagonal
#   blocks and streams them through a double-buffered VMEM scratch, so HBM
#   traffic is the minimal N*128*4 bytes and there is no per-block grid-step
#   overhead.  Output is laid out as (n_blocks, 128) so each block's diagonal
#   is one lane-dense row store.
# ----------------------------------------------------------------------------
def _diag_tanh_blocks_kernel(m_hbm, out_ref, buf, sem, *, bps, n_blocks):
    g = pl.program_id(0)
    base = g * bps
    nb = jnp.minimum(bps, n_blocks - base)     # real 128-blocks in this grid step

    def blk_copy(blk, slot):
        off = pl.multiple_of(blk * _BLK, _BLK)
        return pltpu.make_async_copy(
            m_hbm.at[pl.ds(off, _BLK), pl.ds(off, _BLK)],
            buf.at[slot], sem.at[slot])

    @pl.when(nb > 0)
    def _():
        blk_copy(base, 0).start()              # prime slot 0

    # loop-invariant diagonal mask, built once per grid step (not per block)
    rows = lax.broadcasted_iota(jnp.int32, (_BLK, _BLK), 0)
    cols = lax.broadcasted_iota(jnp.int32, (_BLK, _BLK), 1)
    eye = rows == cols

    @pl.loop(0, nb)
    def _(b):
        slot = b & 1
        blk_copy(base + b, slot).wait()

        @pl.when(b + 1 < nb)                   # prefetch next diagonal block
        def _():
            blk_copy(base + b + 1, 1 - slot).start()

        m = buf[slot].astype(jnp.float32)
        diag = jnp.sum(jnp.where(eye, m, jnp.zeros_like(m)),
                       axis=0, keepdims=True)  # (1, 128)
        out_ref[pl.ds(b, 1), :] = jnp.tanh(diag)


def diag_tanh(M):
    n = int(M.shape[0])
    n_full = n // _BLK

    if n_full < 2:
        # small problem: one full-array block (block == full dims waives (8,128))
        out = pl.pallas_call(
            _diag_tanh_small_kernel,
            out_shape=jax.ShapeDtypeStruct((1, n), jnp.float32),
            grid=(1,),
            in_specs=[pl.BlockSpec((n, n), lambda i: (0, 0))],
            out_specs=pl.BlockSpec((1, n), lambda i: (0, 0)),
        )(M)
        return out.reshape(n)

    rem = n - n_full * _BLK
    grid = 2                                    # >=2 parallel steps feed v7x's 2nd TC
    bps = -(-n_full // grid)                    # 128-blocks per grid step
    n_blk_pad = grid * bps

    kernel = functools.partial(_diag_tanh_blocks_kernel, bps=bps, n_blocks=n_full)
    out = pl.pallas_call(
        kernel,
        out_shape=jax.ShapeDtypeStruct((n_blk_pad, _BLK), jnp.float32),
        grid_spec=pltpu.PrefetchScalarGridSpec(
            num_scalar_prefetch=0,
            grid=(grid,),
            in_specs=[pl.BlockSpec(memory_space=pl.ANY)],      # M stays in HBM
            out_specs=pl.BlockSpec((bps, _BLK), lambda g: (g, 0)),
            scratch_shapes=[
                pltpu.VMEM((2, _BLK, _BLK), M.dtype),          # double-buffered block
                pltpu.SemaphoreType.DMA((2,)),
            ]),
        compiler_params=pltpu.CompilerParams(
            dimension_semantics=("parallel",)),
    )(M)

    score = out.reshape(n_blk_pad * _BLK)[: n_full * _BLK]
    if rem:
        off = n_full * _BLK
        tail = jnp.tanh(jnp.diagonal(M[off:off + rem, off:off + rem])
                        .astype(jnp.float32))
        score = jnp.concatenate([score, tail])
    return score


# ----------------------------------------------------------------------------
# Kernel 2: out[i, :] = x[perm[i], :] * scaled[i]   (scaled = multiplier*score[perm])
#   - perm scalar-prefetched to SMEM; x stays in HBM (pl.ANY)
#   - each grid step batches tk row DMAs (all in flight together) into a VMEM
#     scratch, then does ONE blocked multiply + one lane-dense store.
# ----------------------------------------------------------------------------
def _gather_scale_kernel(perm_ref, x_hbm, scaled_ref, out_ref, xbuf, sem, *, tk):
    b = pl.program_id(0)
    base = b * tk

    # issue all tk row gathers (HBM -> VMEM scratch); unrolled descriptor pushes
    def issue(i, carry):
        p = perm_ref[base + i]
        pltpu.make_async_copy(x_hbm.at[pl.ds(p, 1)],
                              xbuf.at[pl.ds(i, 1)],
                              sem.at[0]).start()
        return carry
    lax.fori_loop(0, tk, issue, 0, unroll=8)

    # wait on each copy with its EXACT descriptor (same perm row / same slices)
    def wait(i, carry):
        p = perm_ref[base + i]
        pltpu.make_async_copy(x_hbm.at[pl.ds(p, 1)],
                              xbuf.at[pl.ds(i, 1)],
                              sem.at[0]).wait()
        return carry
    lax.fori_loop(0, tk, wait, 0, unroll=8)

    # one blocked multiply + one store (scaled_ref carries the compute dtype)
    out_ref[...] = (xbuf[...].astype(scaled_ref.dtype)
                    * scaled_ref[...]).astype(out_ref.dtype)


def gather_scale(x, perm, score_perm, multiplier):
    k = int(perm.shape[0])
    c = int(x.shape[1])

    scaled32 = score_perm.astype(jnp.float32).reshape(k, 1) * float(multiplier)

    if c < _BLK or k < 8:
        # tiny rows: per-row DMA descriptor overhead dominates and the (tk, C)
        # store would be lane-masked -> XLA's gather is at parity or better.
        return (x[perm].astype(jnp.float32) * scaled32).astype(x.dtype)

    # rows per grid step: ~half of k (8-aligned), capped at 256, so many row
    # DMAs are in flight per step and the parallel grid keeps >=2 steps (v7x).
    k8 = ((k + 7) // 8) * 8
    if k8 <= 16:
        tk = k8
    else:
        tk = min(256, max(8, ((k8 // 2 + 7) // 8) * 8))
    k_pad = ((k + tk - 1) // tk) * tk

    # bf16 multiply on bf16 inputs (v6e/v7x bf16 VPU); f32 math otherwise.
    compute_dtype = x.dtype if x.dtype == jnp.bfloat16 else jnp.float32
    scaled = scaled32.astype(compute_dtype)
    perm_i = perm.astype(jnp.int32)
    if k_pad > k:
        pad = k_pad - k
        # padded rows fetch row 0 (valid memory) and are scaled by 0, then sliced off
        perm_i = jnp.concatenate([perm_i, jnp.zeros((pad,), jnp.int32)])
        scaled = jnp.concatenate([scaled, jnp.zeros((pad, 1), compute_dtype)])

    kernel = functools.partial(_gather_scale_kernel, tk=tk)
    out = pl.pallas_call(
        kernel,
        out_shape=jax.ShapeDtypeStruct((k_pad, c), x.dtype),
        grid_spec=pltpu.PrefetchScalarGridSpec(
            num_scalar_prefetch=1,                       # perm -> SMEM
            grid=(k_pad // tk,),
            in_specs=[
                pl.BlockSpec(memory_space=pl.ANY),       # x stays in HBM
                pl.BlockSpec((tk, 1), lambda b, perm_ref: (b, 0)),   # scaled scores
            ],
            out_specs=pl.BlockSpec((tk, c), lambda b, perm_ref: (b, 0)),
            scratch_shapes=[
                pltpu.VMEM((tk, c), x.dtype),            # gathered row buffer
                pltpu.SemaphoreType.DMA((1,)),
            ]),
        compiler_params=pltpu.CompilerParams(
            dimension_semantics=("parallel",)),
    )(perm_i, x, scaled)

    return out[:k] if k_pad > k else out


# ----------------------------------------------------------------------------
# Module wrapper (no learnable parameters in PANUMPooling)
# ----------------------------------------------------------------------------
class PANUMPoolingPallas:
    def __init__(self, in_channels, ratio=0.5, min_score=None, multiplier=1):
        self.in_channels = in_channels
        self.ratio = ratio
        self.min_score = min_score
        self.multiplier = multiplier

    def __call__(self, x, edge_index, edge_weight=None, M=None, UM=None,
                 batch=None, num_nodes=None, exact_edge_shapes=True):
        N = int(x.shape[0])
        E = int(edge_index.shape[1])
        if batch is None:
            batch = jnp.zeros((N,), dtype=jnp.int32)
        if edge_weight is None:
            edge_weight = jnp.ones((E,), dtype=jnp.float32)

        if self.min_score is not None:
            # TODO(synk): min_score != None path (softmax over batch + scatter_max
            # threshold) is not implemented.
            raise NotImplementedError("min_score != None path not implemented")

        # score = tanh(diag(M))  -- Pallas kernel(s)
        score = diag_tanh(M)
        # TODO(synk): true multi-graph batched top-k (variable-length per-graph
        # outputs); the default single-graph call (batch=None) matches PyTorch.

        # top-k (single graph): sort descending, keep ceil(ratio * N)
        k = int(math.ceil(self.ratio * N))
        perm = jnp.argsort(-score)[:k].astype(jnp.int32)
        score_perm = score[perm]

        # x = x[perm] * score[perm].view(-1, 1); x = multiplier * x  -- Pallas kernel
        x_out = gather_scale(x, perm, score_perm, self.multiplier)
        batch_out = batch[perm]

        # filter_adj: relabel nodes, keep edges with both endpoints surviving.
        node_map = jnp.full((N,), -1, dtype=jnp.int32).at[perm].set(
            jnp.arange(k, dtype=jnp.int32))
        row = node_map[edge_index[0]]
        col = node_map[edge_index[1]]
        keep = (row >= 0) & (col >= 0)
        num_kept = jnp.sum(keep.astype(jnp.int32))
        (kept_idx,) = jnp.nonzero(keep, size=E, fill_value=0)   # order-preserving
        edge_index_full = jnp.stack([row[kept_idx], col[kept_idx]], axis=0)
        edge_weight_full = edge_weight[kept_idx]

        if exact_edge_shapes:
            # Single scalar device->host sync, issued only AFTER all device work
            # above was dispatched, to size outputs exactly like PyTorch.
            n_edges = int(num_kept)
            edge_index_out = edge_index_full[:, :n_edges]
            edge_weight_out = edge_weight_full[:n_edges]
        else:
            # Sync-free variant: fixed (2, E)/(E,) outputs; entries >= num_kept are
            # padding (edge_index = -1, edge_weight = 0) that downstream can mask.
            valid = jnp.arange(E) < num_kept
            edge_index_out = jnp.where(valid[None, :], edge_index_full, -1)
            edge_weight_out = jnp.where(valid, edge_weight_full,
                                        jnp.zeros_like(edge_weight_full))

        return (x_out, edge_index_out, edge_weight_out, batch_out, perm,
                score_perm)


# ----------------------------------------------------------------------------
if __name__ == "__main__":
    def run_case(key, N, C, E, ratio, multiplier):
        k1, k2, k3, k4 = jax.random.split(key, 4)
        x = jax.random.normal(k1, (N, C), dtype=jnp.float32)
        M = jax.random.normal(k2, (N, N), dtype=jnp.float32)
        # well-separated diagonal so the top-k ordering is insensitive to tiny
        # tanh-implementation differences between the Pallas kernel and the XLA ref
        diag_vals = jax.random.permutation(k3, jnp.linspace(-2.0, 2.0, N))
        M = M.at[jnp.arange(N), jnp.arange(N)].set(diag_vals)
        edge_index = jax.random.randint(k4, (2, E), 0, N, dtype=jnp.int32)

        pool = PANUMPoolingPallas(in_channels=C, ratio=ratio, multiplier=multiplier)
        x_out, ei_out, ew_out, batch_out, perm, score_perm = pool(
            x, edge_index, M=M)
        jax.block_until_ready(x_out)
        jax.block_until_ready(score_perm)

        # pure-JAX reference
        score_ref = jnp.tanh(jnp.diag(M))
        kk = int(math.ceil(ratio * N))
        perm_ref = jnp.argsort(-score_ref)[:kk]
        x_ref = x[perm_ref] * score_ref[perm_ref][:, None] * multiplier

        assert np.array_equal(np.asarray(perm), np.asarray(perm_ref))
        assert np.allclose(np.asarray(score_perm),
                           np.asarray(score_ref[perm_ref]), atol=1e-5)
        assert np.allclose(np.asarray(x_out), np.asarray(x_ref), atol=1e-5)

        # edge-filtering reference (order-preserving boolean compaction)
        mask_np = np.full((N,), -1, dtype=np.int64)
        mask_np[np.asarray(perm_ref)] = np.arange(kk)
        ei_np = np.asarray(edge_index)
        row_r = mask_np[ei_np[0]]
        col_r = mask_np[ei_np[1]]
        keep_r = (row_r >= 0) & (col_r >= 0)
        ei_ref = np.stack([row_r[keep_r], col_r[keep_r]], axis=0)
        ew_ref = np.ones(E, np.float32)[keep_r]
        assert np.array_equal(np.asarray(ei_out), ei_ref)
        assert np.allclose(np.asarray(ew_out), ew_ref)
        assert np.array_equal(np.asarray(batch_out), np.zeros(kk, np.int32))

    key1, key2 = jax.random.split(jax.random.PRNGKey(0))
    # small case: full-block diag kernel + plain-JAX gather fallback (C < 128)
    run_case(key1, N=16, C=4, E=40, ratio=0.5, multiplier=1)
    # larger case: HBM diagonal-block diag kernel (2 full 128-blocks + 44-row tail)
    # and the Pallas scalar-prefetch gather kernel (C=128, tk=80, 2 parallel steps)
    run_case(key2, N=300, C=128, E=600, ratio=0.5, multiplier=2)

    print("KERNEL_OK")
</pallas_src>

<mosaic_0001>
module attributes {stable_mosaic.version = 11 : i64} {
  func.func @_diag_tanh_small_kernel(%arg0: i32, %arg1: memref<16x16xf32, #tpu.memory_space<vmem>>, %arg2: memref<1x16xf32, #tpu.memory_space<vmem>>) attributes {dimension_semantics = [#tpu.dimension_semantics<arbitrary>], iteration_bounds = array<i64: 1>, scalar_prefetch = 0 : i64, scratch_operands = 0 : i64, tpu.core_type = #tpu.core_type<tc>, window_params = [{pipeline_mode = #tpu.pipeline_mode<synchronous>, transform_indices = @transform_0, window_bounds = array<i64: 16, 16>}, {pipeline_mode = #tpu.pipeline_mode<synchronous>, transform_indices = @transform_1, window_bounds = array<i64: 1, 16>}]} {
    %c0 = arith.constant 0 : index
    %c0_0 = arith.constant 0 : index
    %0 = vector.load %arg1[%c0, %c0_0] : memref<16x16xf32, #tpu.memory_space<vmem>>, vector<16x16xf32>
    %1 = tpu.iota {dimensions = array<i32: 0>} : vector<16x16xi32>
    %2 = tpu.iota {dimensions = array<i32: 1>} : vector<16x16xi32>
    %3 = arith.cmpi eq, %1, %2 : vector<16x16xi32>
    %cst = arith.constant 0.000000e+00 : f32
    %4 = vector.broadcast %cst : f32 to vector<16x16xf32>
    %5 = arith.select %3, %0, %4 : vector<16x16xi1>, vector<16x16xf32>
    %cst_1 = arith.constant dense<0.000000e+00> : vector<16xf32>
    %6 = vector.multi_reduction <add>, %5, %cst_1 [0] : vector<16x16xf32> to vector<16xf32>
    %7 = vector.shape_cast %6 : vector<16xf32> to vector<1x16xf32>
    %8 = math.tanh %7 : vector<1x16xf32>
    %c0_2 = arith.constant 0 : index
    %c0_3 = arith.constant 0 : index
    %9 = vector.load %arg2[%c0_2, %c0_3] : memref<1x16xf32, #tpu.memory_space<vmem>>, vector<1x16xf32>
    tpu.vector_store %arg2[%c0_2, %c0_3], %8 {strides = array<i32>} : memref<1x16xf32, #tpu.memory_space<vmem>>, vector<1x16xf32>,
    return
  }
  func.func @transform_0(%arg0: i32) -> (i32, i32) {
    %c0_i32 = arith.constant 0 : i32
    %c0_i32_0 = arith.constant 0 : i32
    %c0_i32_1 = arith.constant 0 : i32
    return %c0_i32, %c0_i32_0 : i32, i32
  }
  func.func @transform_1(%arg0: i32) -> (i32, i32) {
    %c0_i32 = arith.constant 0 : i32
    %c0_i32_0 = arith.constant 0 : i32
    %c0_i32_1 = arith.constant 0 : i32
    return %c0_i32, %c0_i32_0 : i32, i32
  }
}

</mosaic_0001>

<bundles_post_ra>
// kernel: tpu_custom_call.1
= control target key start
LH: loop header
LB: loop body
LE: loop exit
PB: predicated region body
PF: predicated region fallthrough
CT: control target
= control target key end

     0   :  { %6 = vsyncpa [#allocation3], 0  ;;  %s132_s0 = inlined_call_operand.hbm [shape: f32[16,16], index: 0, kind: input, shape index: {}]   ;;  %s133_s1 = inlined_call_operand.hbm [shape: f32[1,16], index: 1, kind: output, shape index: {}]  }
   0x1   :  { %7 = vsyncpa [#allocation4], 0  ;;  %s112_s6 = smov [#allocation2]  }
   0x2   :  { %s13_s7 = sshll.u32 %s112_s6, 4  ;;  %s14_s7 = int_to_ptr.vmem [resolvable:$true] %s13_s7 }
   0x3   :  { %s76_s8 = scalar_lea.vmem %s14_s7, 256  ;;  %p81_p1 = scmp.lt.s32.totalorder %s14_s7, %s14_s7 }
   0x4   :  { %p77_p0 = scmp.ne.s32.totalorder %s14_s7, %s76_s8  ;;  %p82_p2 = scmp.lt.s32.totalorder %s76_s8, %s76_s8 }
   0x6   :  { %p83_p3 = por %p82_p2, %p81_p1 }
   0x8   :  { %p84_p4 = pnand %p83_p3, %p77_p0 }
   0xa   :  { %87 = shalt.err (!%p84_p4)
}
   0xb   :  { %s113_s9 = smov 128   ;;  %s114_s10 = smov 8  }
   0xc   :  { %19 = dma.hbm_to_vmem [thread:$0]  %s132_s0, 256, %s14_s7, [#allocation3], %s113_s9, %s113_s9, %s114_s10  }
   0xd   :  { %108 = dma.done.wait [#allocation3], 256  }
   0xe   :  { %109 = vsyncadd [#allocation3], 4294967040  ;;  %v25_v0 = vlaneseq  ;;  %vm34_vm2 = vcmask 130048   ;;  %v23_v4 = vld [vmem:[#allocation2] sm:$0xff]  ;;  %v24_v5 = vld [vmem:[#allocation2 + $0x8] sm:$0xff]  ;;  %s115_s0 = smov [#allocation5]  }
   0xf   :  { %s53_s13 = sshll.u32 %s115_s0, 4  ;;  %vm45_vm3 = vcmask 122880   ;;  %s54_s13 = int_to_ptr.vmem [resolvable:$true] %s53_s13 }
  0x10   :  { %v26_v1 = vshrl.u32 %v25_v0, 7  ;;  %v29_v2 = vand.u32 127, %v25_v0  ;;  %s88_s14 = scalar_lea.vmem %s54_s13, 16  ;;  %s92_s15 = scalar_lea.vmem %s54_s13, 32 }
  0x11   :  { %p89_p5 = scmp.ne.s32.totalorder %s54_s13, %s88_s14  ;;  %p93_p6 = scmp.lt.s32.totalorder %s54_s13, %s54_s13 }
  0x12   :  { %v27_v3 = vadd.s32 8, %v26_v1  ;;  %vm30_vm0 = vcmp.eq.s32.totalorder %v26_v1, %v29_v2  ;;  %p94_p7 = scmp.lt.s32.totalorder %s92_s15, %s88_s14 }
  0x13   :  { %v32_v6 = vsel %vm30_vm0, %v23_v4, 0.0 }
  0x14   :  { %vm31_vm1 = vcmp.eq.s32.totalorder %v27_v3, %v29_v2  ;;  %v35_v8 = vsel %vm34_vm2, %v32_v6, 0.0  ;;  %p95_p8 = por %p94_p7, %p93_p6 }
  0x15   :  { %v33_v7 = vsel %vm31_vm1, %v24_v5, 0.0 }
  0x16   :  { %v36_v9 = vsel %vm34_vm2, %v33_v7, 0.0  ;;  %p96_p9 = pnand %p95_p8, %p89_p5 }
  0x17   :  { %v37_v10 = vadd.f32 %v36_v9, %v35_v8 }
  0x19   :  { %v38_v11 = vrot.slane %v37_v10, 4 }
  0x1b   :  { %v39_v12 = vadd.f32 %v38_v11, %v37_v10 }
  0x1d   :  { %v40_v13 = vrot.slane %v39_v12, 2 }
  0x1f   :  { %v41_v14 = vadd.f32 %v40_v13, %v39_v12 }
  0x21   :  { %v42_v15 = vrot.slane %v41_v14, 1 }
  0x23   :  { %v43_v16 = vadd.f32 %v42_v15, %v41_v14 }
  0x25   :  { %66 = vtanh.f32 %v43_v16 }
  0x32   :  { %v67_v17 = vpop.eup %66 }
  0x33   :  { %46 = vst.msk [vmem:[#allocation5] sm:$0x1] %vm45_vm3, %v67_v17 }
  0x34   :  { %99 = shalt.err (!%p96_p9)
}
  0x35   :  { %56 = dma.vmem_to_hbm [thread:$0]  %s54_s13, 16, %s133_s1, [#allocation4]  }
  0x36   :  { %110 = dma.done.wait [#allocation4], 16  }
  0x37   :  { %111 = vsyncadd [#allocation4], 4294967280 }
  0x38   :  { %60 = vsyncpa [#allocation3], 1 }
  0x39   :  { %61 = vsyncpa [#allocation4], 1 }

</bundles_post_ra>
